<compile_context>
chip_gen: v6e
topology: v6e:2x2x1
jax: 0.10.0
libtpu: 0.0.40
codegen_flags: <defaults>
</compile_context>

<pallas_src>
import jax
import jax.numpy as jnp
from jax.experimental import pallas as pl
from jax.experimental.pallas import tpu as pltpu


def _cls_head_kernel(x_ref, w1_ref, b1_ref, w2_ref, b2_ref, out_ref):
    # x:  [TB, H]   w1: [H, H]       b1: [1, H]
    # w2: [H, NP]   b2: [1, NP]      out: [TB, NP]   (NP = padded label lanes)
    x = x_ref[...]
    # dense + bias, f32 accumulation on the MXU
    h = jnp.dot(x, w1_ref[...], preferred_element_type=jnp.float32) + b1_ref[...]
    # tanh in f32 (EUP slot; do NOT downcast before the transcendental)
    h = jnp.tanh(h)
    # out_proj + bias, lane-padded to NP so the store below is unmasked
    o = jnp.dot(h.astype(w2_ref.dtype), w2_ref[...],
                preferred_element_type=jnp.float32) + b2_ref[...]
    out_ref[...] = o.astype(out_ref.dtype)


def roberta_classification_head(x, w_dense, b_dense, w_out, b_out, *, block_b=256):
    """x: [B, H]. Weights pre-transposed to (in, out): w_dense [H, H], w_out [H, L]."""
    B, H = x.shape
    num_labels = w_out.shape[1]

    # --- lane-dense output: pad label dim up to a multiple of 128 -------------
    n_pad = max(128, ((num_labels + 127) // 128) * 128)
    if n_pad != num_labels:
        w_out_p = jnp.pad(w_out, ((0, 0), (0, n_pad - num_labels)))
        b_out_p = jnp.pad(b_out, ((0, 0), (0, n_pad - num_labels)))
    else:
        w_out_p, b_out_p = w_out, b_out

    # --- batch tiling: TB multiple of 8, pad B so every grid step is full -----
    TB = min(block_b, B)
    TB = max(8, (TB // 8) * 8)
    B_pad = pl.cdiv(B, TB) * TB
    x_p = jnp.pad(x, ((0, B_pad - B), (0, 0))) if B_pad != B else x
    grid = (B_pad // TB,)

    # --- explicit scoped-VMEM budget from the chosen tiles (with headroom) ----
    itemsize = x.dtype.itemsize
    resident = (w_dense.nbytes + w_out_p.nbytes + b_dense.nbytes + b_out_p.nbytes)
    streamed = 2 * (TB * H * itemsize + TB * n_pad * itemsize)  # double-buffered x/out
    vmem_limit = int(1.5 * (2 * resident + streamed)) + (1 << 20)
    vmem_limit = max(4 << 20, min(vmem_limit, 100 << 20))

    out_padded = pl.pallas_call(
        _cls_head_kernel,
        out_shape=jax.ShapeDtypeStruct((B_pad, n_pad), x.dtype),
        grid_spec=pltpu.PrefetchScalarGridSpec(
            num_scalar_prefetch=0,
            grid=grid,
            in_specs=[
                pl.BlockSpec((TB, H), lambda i: (i, 0)),       # x tile (streamed)
                pl.BlockSpec((H, H), lambda i: (0, 0)),        # w1 (VMEM-resident)
                pl.BlockSpec((1, H), lambda i: (0, 0)),        # b1 (resident)
                pl.BlockSpec((H, n_pad), lambda i: (0, 0)),    # w2 padded (resident)
                pl.BlockSpec((1, n_pad), lambda i: (0, 0)),    # b2 padded (resident)
            ],
            out_specs=pl.BlockSpec((TB, n_pad), lambda i: (i, 0)),
        ),
        compiler_params=pltpu.CompilerParams(
            dimension_semantics=("parallel",),   # independent batch tiles (v7x 2 TCs)
            vmem_limit_bytes=vmem_limit,
        ),
    )(x_p, w_dense, b_dense, w_out_p, b_out_p)

    # Drop batch padding and the zero label lanes.
    return out_padded[:B, :num_labels]


if __name__ == "__main__":
    # Small shapes implied by the module: hidden_size=32, batch=8, num_labels=2.
    B, H, NUM_LABELS = 8, 32, 2

    key = jax.random.PRNGKey(0)
    k_x, k_w1, k_b1, k_w2, k_b2 = jax.random.split(key, 5)

    x = jax.random.normal(k_x, (B, H), dtype=jnp.float32)

    # PyTorch Linear weight shapes: dense (H, H), out_proj (2, H).
    # Stored pre-transposed to (in, out) for the kernel.
    w_dense = jax.random.normal(k_w1, (H, H), dtype=jnp.float32) * 0.02
    b_dense = jax.random.normal(k_b1, (1, H), dtype=jnp.float32) * 0.02
    w_out = jax.random.normal(k_w2, (H, NUM_LABELS), dtype=jnp.float32) * 0.02
    b_out = jax.random.normal(k_b2, (1, NUM_LABELS), dtype=jnp.float32) * 0.02

    out = roberta_classification_head(x, w_dense, b_dense, w_out, b_out)
    out = jax.block_until_ready(out)

    # Reference check in plain JAX (same math as the PyTorch forward).
    ref = jnp.tanh(x @ w_dense + b_dense) @ w_out + b_out
    assert out.shape == (B, NUM_LABELS)
    assert jnp.allclose(out, ref, atol=1e-5, rtol=1e-5)

    print("KERNEL_OK")
</pallas_src>

<mosaic_0001>
module attributes {stable_mosaic.version = 11 : i64} {
  func.func @_cls_head_kernel(%arg0: i32, %arg1: memref<8x32xf32, #tpu.memory_space<vmem>>, %arg2: memref<32x32xf32, #tpu.memory_space<vmem>>, %arg3: memref<1x32xf32, #tpu.memory_space<vmem>>, %arg4: memref<32x128xf32, #tpu.memory_space<vmem>>, %arg5: memref<1x128xf32, #tpu.memory_space<vmem>>, %arg6: memref<8x128xf32, #tpu.memory_space<vmem>>) attributes {dimension_semantics = [#tpu.dimension_semantics<parallel>], iteration_bounds = array<i64: 1>, scalar_prefetch = 0 : i64, scratch_operands = 0 : i64, tpu.core_type = #tpu.core_type<tc>, window_params = [{transform_indices = @transform_0, window_bounds = array<i64: 8, 32>}, {pipeline_mode = #tpu.pipeline_mode<synchronous>, transform_indices = @transform_1, window_bounds = array<i64: 32, 32>}, {pipeline_mode = #tpu.pipeline_mode<synchronous>, transform_indices = @transform_2, window_bounds = array<i64: 1, 32>}, {pipeline_mode = #tpu.pipeline_mode<synchronous>, transform_indices = @transform_3, window_bounds = array<i64: 32, 128>}, {pipeline_mode = #tpu.pipeline_mode<synchronous>, transform_indices = @transform_4, window_bounds = array<i64: 1, 128>}, {transform_indices = @transform_5, window_bounds = array<i64: 8, 128>}]} {
    %c0 = arith.constant 0 : index
    %c0_0 = arith.constant 0 : index
    %0 = vector.load %arg1[%c0, %c0_0] : memref<8x32xf32, #tpu.memory_space<vmem>>, vector<8x32xf32>
    %c0_1 = arith.constant 0 : index
    %c0_2 = arith.constant 0 : index
    %1 = vector.load %arg2[%c0_1, %c0_2] : memref<32x32xf32, #tpu.memory_space<vmem>>, vector<32x32xf32>
    %cst = arith.constant dense<0.000000e+00> : vector<8x32xf32>
    %2 = tpu.matmul %0, %1, %cst {dimension_numbers = #tpu.dot_dimension_numbers<[1], [0], [0], [1], [0, 0, 1, 1], [], []>} : vector<8x32xf32>, vector<32x32xf32>, vector<8x32xf32> -> vector<8x32xf32>
    %c0_3 = arith.constant 0 : index
    %c0_4 = arith.constant 0 : index
    %3 = vector.load %arg3[%c0_3, %c0_4] : memref<1x32xf32, #tpu.memory_space<vmem>>, vector<1x32xf32>
    %4 = vector.broadcast %3 : vector<1x32xf32> to vector<8x32xf32>
    %5 = arith.addf %2, %4 : vector<8x32xf32>
    %6 = math.tanh %5 : vector<8x32xf32>
    %c0_5 = arith.constant 0 : index
    %c0_6 = arith.constant 0 : index
    %7 = vector.load %arg4[%c0_5, %c0_6] : memref<32x128xf32, #tpu.memory_space<vmem>>, vector<32x128xf32>
    %cst_7 = arith.constant dense<0.000000e+00> : vector<8x128xf32>
    %8 = tpu.matmul %6, %7, %cst_7 {dimension_numbers = #tpu.dot_dimension_numbers<[1], [0], [0], [1], [0, 0, 1, 1], [], []>} : vector<8x32xf32>, vector<32x128xf32>, vector<8x128xf32> -> vector<8x128xf32>
    %c0_8 = arith.constant 0 : index
    %c0_9 = arith.constant 0 : index
    %9 = vector.load %arg5[%c0_8, %c0_9] : memref<1x128xf32, #tpu.memory_space<vmem>>, vector<1x128xf32>
    %10 = vector.broadcast %9 : vector<1x128xf32> to vector<8x128xf32>
    %11 = arith.addf %8, %10 : vector<8x128xf32>
    %c0_10 = arith.constant 0 : index
    %c0_11 = arith.constant 0 : index
    %12 = vector.load %arg6[%c0_10, %c0_11] : memref<8x128xf32, #tpu.memory_space<vmem>>, vector<8x128xf32>
    tpu.vector_store %arg6[%c0_10, %c0_11], %11 {strides = array<i32>} : memref<8x128xf32, #tpu.memory_space<vmem>>, vector<8x128xf32>,
    return
  }
  func.func @transform_0(%arg0: i32) -> (i32, i32) {
    %c0_i32 = arith.constant 0 : i32
    %c0_i32_0 = arith.constant 0 : i32
    return %arg0, %c0_i32 : i32, i32
  }
  func.func @transform_1(%arg0: i32) -> (i32, i32) {
    %c0_i32 = arith.constant 0 : i32
    %c0_i32_0 = arith.constant 0 : i32
    %c0_i32_1 = arith.constant 0 : i32
    return %c0_i32, %c0_i32_0 : i32, i32
  }
  func.func @transform_2(%arg0: i32) -> (i32, i32) {
    %c0_i32 = arith.constant 0 : i32
    %c0_i32_0 = arith.constant 0 : i32
    %c0_i32_1 = arith.constant 0 : i32
    return %c0_i32, %c0_i32_0 : i32, i32
  }
  func.func @transform_3(%arg0: i32) -> (i32, i32) {
    %c0_i32 = arith.constant 0 : i32
    %c0_i32_0 = arith.constant 0 : i32
    %c0_i32_1 = arith.constant 0 : i32
    return %c0_i32, %c0_i32_0 : i32, i32
  }
  func.func @transform_4(%arg0: i32) -> (i32, i32) {
    %c0_i32 = arith.constant 0 : i32
    %c0_i32_0 = arith.constant 0 : i32
    %c0_i32_1 = arith.constant 0 : i32
    return %c0_i32, %c0_i32_0 : i32, i32
  }
  func.func @transform_5(%arg0: i32) -> (i32, i32) {
    %c0_i32 = arith.constant 0 : i32
    %c0_i32_0 = arith.constant 0 : i32
    return %arg0, %c0_i32 : i32, i32
  }
}

</mosaic_0001>

<bundles_post_ra>
// kernel: tpu_custom_call.1
= control target key start
LH: loop header
LB: loop body
LE: loop exit
PB: predicated region body
PF: predicated region fallthrough
CT: control target
= control target key end

     0   :  { %10 = vsyncpa [#allocation3], 0  ;;  %s438_s0 = inlined_call_operand.hbm [shape: f32[8,32], index: 0, kind: input, shape index: {}]   ;;  %s439_s1 = inlined_call_operand.hbm [shape: f32[32,32], index: 1, kind: input, shape index: {}]   ;;  %s440_s2 = inlined_call_operand.vmem [shape: f32[1,32], index: 2, kind: input, shape index: {}]   ;;  %s441_s3 = inlined_call_operand.hbm [shape: f32[32,128], index: 3, kind: input, shape index: {}]   ;;  %s442_s4 = inlined_call_operand.vmem [shape: f32[1,128], index: 4, kind: input, shape index: {}]   ;;  %s443_s5 = inlined_call_operand.hbm [shape: f32[8,128], index: 5, kind: output, shape index: {}]  }
   0x1   :  { %11 = vsyncpa [#allocation6], 0 }
   0x2   :  { %12 = vsyncpa [#allocation4], 0  ;;  %s380_s18 = smov [#allocation5]  }
   0x3   :  { %s28_s19 = sshll.u32 %s380_s18, 4  ;;  %s29_s19 = int_to_ptr.vmem [resolvable:$true] %s28_s19 }
   0x4   :  { %s302_s20 = scalar_lea.vmem %s29_s19, 512  ;;  %p307_p1 = scmp.lt.s32.totalorder %s29_s19, %s29_s19 }
   0x5   :  { %p303_p0 = scmp.ne.s32.totalorder %s29_s19, %s302_s20  ;;  %p308_p2 = scmp.lt.s32.totalorder %s302_s20, %s302_s20 }
   0x7   :  { %p309_p3 = por %p308_p2, %p307_p1 }
   0x9   :  { %p310_p4 = pnand %p309_p3, %p303_p0 }
   0xb   :  { %313 = shalt.err (!%p310_p4)
}
   0xc   :  { %s381_s21 = smov 128   ;;  %s382_s22 = smov 8  }
   0xd   :  { %34 = dma.hbm_to_vmem [thread:$0]  %s439_s1, 512, %s29_s19, [#allocation6], %s381_s21, %s381_s21, %s382_s22  }
   0xe   :  { %s383_s25 = smov [#allocation2]   ;;  %s384_s27 = smov [#allocation7]  }
   0xf   :  { %s19_s26 = sshll.u32 %s383_s25, 4  ;;  %s42_s28 = sshll.u32 %s384_s27, 4  ;;  %s20_s26 = int_to_ptr.vmem [resolvable:$true] %s19_s26  ;;  %s43_s28 = int_to_ptr.vmem [resolvable:$true] %s42_s28 }
  0x10   :  { %s322_s29 = scalar_lea.vmem %s20_s26, 128  ;;  %p327_p6 = scmp.lt.s32.totalorder %s20_s26, %s20_s26 }
  0x11   :  { %p323_p5 = scmp.ne.s32.totalorder %s20_s26, %s322_s29  ;;  %p328_p7 = scmp.lt.s32.totalorder %s322_s29, %s322_s29 }
  0x13   :  { %p329_p8 = por %p328_p7, %p327_p6 }
  0x15   :  { %p330_p9 = pnand %p329_p8, %p323_p5 }
  0x17   :  { %333 = shalt.err (!%p330_p9)
}
  0x18   :  { %22 = dma.hbm_to_vmem [thread:$0]  %s438_s0, 128, %s20_s26, [#allocation3]  }
  0x19   :  { %s342_s7 = scalar_lea.vmem %s43_s28, 512  ;;  %p347_p11 = scmp.lt.s32.totalorder %s43_s28, %s43_s28 }
  0x1a   :  { %p343_p10 = scmp.ne.s32.totalorder %s43_s28, %s342_s7  ;;  %p348_p12 = scmp.lt.s32.totalorder %s342_s7, %s342_s7 }
  0x1c   :  { %p349_p13 = por %p348_p12, %p347_p11 }
  0x1e   :  { %p350_p0 = pnand %p349_p13, %p343_p10 }
  0x20   :  { %353 = shalt.err (!%p350_p0)
}
  0x21   :  { %48 = dma.hbm_to_vmem [thread:$0]  %s441_s3, 512, %s43_s28, [#allocation6], %s381_s21, %s381_s21, %s382_s22  }
  0x22   :  { %374 = dma.done.wait [#allocation3], 128  }
  0x23   :  { %375 = vsyncadd [#allocation3], 4294967168 }
  0x24   :  { %376 = dma.done.wait [#allocation6], 1024  }
  0x25   :  { %377 = vsyncadd [#allocation6], 4294966272  ;;  %v385_v0 = vmov 0.0   ;;  %vm386_vm0 = vmmov 0   ;;  %v64_v1 = vld [vmem:[#allocation5 + $0x18] sm:$0xff]  ;;  %v63_v2 = vld [vmem:[#allocation5 + $0x10] sm:$0xff] }
  0x26   :  { %262 = vmatprep.subr.mxu0 %v385_v0  ;;  %270 = vmatprep.mubr.msk.f32.mxu0 %vm386_vm0, %v385_v0  ;;  %v62_v3 = vld [vmem:[#allocation5 + $0x8] sm:$0xff]  ;;  %v61_v4 = vld [vmem:[#allocation5] sm:$0xff]  ;;  %v60_v5 = vld [vmem:[#allocation2] sm:$0xff]  ;;  %vm72_vm1 = vcmask 261120   ;;  %s387_s11 = smov [#allocation8]  }
  0x27   :  { %273 = vmatprep.subr.mxu1 %v385_v0  ;;  %281 = vmatprep.mubr.msk.f32.mxu1 %vm386_vm0, %v385_v0  ;;  %v150_v6 = vld [vmem:[#allocation7 + $0x18] sm:$0xff]  ;;  %v149_v7 = vld [vmem:[#allocation7 + $0x10] sm:$0xff]  ;;  %v148_v8 = vld [vmem:[#allocation7 + $0x8] sm:$0xff]  ;;  %s238_s12 = sshll.u32 %s387_s11, 4  ;;  %s239_s12 = int_to_ptr.vmem [resolvable:$true] %s238_s12 }
  0x28   :  { %263 = vmatpush3.msra.mxu0 %v64_v1  ;;  %274 = vmatpush3.msra.mxu1 %v150_v6  ;;  %v147_v9 = vld [vmem:[#allocation7] sm:$0xff]  ;;  %v248_v10 = vld [vmem:[%s440_s2] ss:$0 sm:$0xff]  ;;  %s354_s13 = scalar_lea.vmem %s239_s12, 128  ;;  %p359_p2 = scmp.lt.s32.totalorder %s239_s12, %s239_s12 }
  0x29   :  { %264 = vmatprep.subr.mxu0 %v385_v0  ;;  %275 = vmatprep.subr.mxu1 %v385_v0  ;;  %v250_v15 = vld [vmem:[%s442_s4] ss:$0 sm:$0xff]  ;;  %p355_p1 = scmp.ne.s32.totalorder %s239_s12, %s354_s13  ;;  %p360_p3 = scmp.lt.s32.totalorder %s354_s13, %s354_s13 }
  0x2a   :  { %265 = vmatpush3.msra.mxu0 %v63_v2  ;;  %276 = vmatpush3.msra.mxu1 %v149_v7 }
  0x2b   :  { %266 = vmatprep.subr.mxu0 %v385_v0  ;;  %277 = vmatprep.subr.mxu1 %v385_v0  ;;  %p361_p4 = por %p360_p3, %p359_p2 }
  0x2c   :  { %267 = vmatpush3.msra.mxu0 %v62_v3  ;;  %278 = vmatpush3.msra.mxu1 %v148_v8 }
  0x2d   :  { %268 = vmatprep.subr.mxu0 %v385_v0  ;;  %279 = vmatprep.subr.mxu1 %v385_v0  ;;  %p362_p5 = pnand %p361_p4, %p355_p1 }
  0x2e   :  { %269 = vmatpush3.msra.mxu0 %v61_v4  ;;  %280 = vmatpush3.msra.mxu1 %v147_v9 }
  0x2f   :  { %271 = vmatmul.mubr.msk.f32.vlgmr.msra.gmra.mxu0 %vm72_vm1, %v60_v5 }
  0xef   :  { %v142_v11 = vpop.f32.mrf.mxu0 }
  0xf0   :  { %v143_v12 = vadd.f32 %v248_v10, %v142_v11 }
  0xf1   :  { %v272_v13 = vpop.f32.mrf.mxu0 }
  0xf2   :  { %292 = vtanh.f32 %v143_v12 }
  0xff   :  { %v293_v14 = vpop.eup %292 }
 0x100   :  { %282 = vmatmul.mubr.msk.f32.vlgmr.msra.gmra.mxu1 %vm72_vm1, %v293_v14 }
 0x1c0   :  { %v227_v16 = vpop.f32.mrf.mxu1 }
 0x1c1   :  { %v228_v17 = vadd.f32 %v250_v15, %v227_v16 }
 0x1c2   :  { %v283_v18 = vpop.f32.mrf.mxu1 }
 0x1c3   :  { %231 = vst [vmem:[#allocation8] sm:$0xff] %v228_v17 }
 0x1c4   :  { %365 = shalt.err (!%p362_p5)
}
 0x1c5   :  { %241 = dma.vmem_to_hbm [thread:$0]  %s239_s12, 128, %s443_s5, [#allocation4]  }
 0x1c6   :  { %378 = dma.done.wait [#allocation4], 128  }
 0x1c7   :  { %379 = vsyncadd [#allocation4], 4294967168 }
 0x1c8   :  { %245 = vsyncpa [#allocation3], 1 }
 0x1c9   :  { %246 = vsyncpa [#allocation6], 1 }
 0x1ca   :  { %247 = vsyncpa [#allocation4], 1 }

</bundles_post_ra>
